<compile_context>
chip_gen: v5e
topology: v5e:2x2
jax: 0.10.0
libtpu: 0.0.40
codegen_flags: <defaults>
</compile_context>

<pallas_src>
import functools

import jax
import jax.numpy as jnp
from jax.experimental import pallas as pl
from jax.experimental.pallas import tpu as pltpu


def _round_up(n, m):
    return (n + m - 1) // m * m


# ---------------------------------------------------------------------------
# Kernel  (batch-on-lanes: every tensor is (features, batch_tile))
# ---------------------------------------------------------------------------
def dqn_kernel(x_ref, w1_ref, b1_ref, w2_ref, b2_ref, w3_ref, b3_ref, o_ref):
    # In-kernel cast of the activations to the weight compute dtype (bf16 on
    # the fast path); rides a free VPU slot, saves a wrapper-side XLA pass.
    x = x_ref[...].astype(w1_ref.dtype)

    # fc1 + relu: (h1, s) @ (s, bm) -> (h1, bm), f32 accumulate.
    h1 = jnp.dot(w1_ref[...], x, preferred_element_type=jnp.float32)
    h1 = jnp.maximum(h1 + b1_ref[...], 0.0)

    # fc2 + relu: (h2, h1) @ (h1, bm) -> (h2, bm)
    h2 = jnp.dot(w2_ref[...], h1.astype(w2_ref.dtype),
                 preferred_element_type=jnp.float32)
    h2 = jnp.maximum(h2 + b2_ref[...], 0.0)

    # fc4 (no activation): (a_pad, h2) @ (h2, bm) -> (a_pad, bm)
    out = jnp.dot(w3_ref[...], h2.astype(w3_ref.dtype),
                  preferred_element_type=jnp.float32)
    o_ref[...] = (out + b3_ref[...]).astype(o_ref.dtype)


# ---------------------------------------------------------------------------
# Wrapper
# ---------------------------------------------------------------------------
def dqn_forward(x, params, action_size, *, block_batch=1024):
    """x: (B, state_size) f32.  params: padded params from prepare_params.

    Returns (B, action_size) f32 Q-values (matches the PyTorch module).
    """
    w1, b1 = params["w1"], params["b1"]
    w2, b2 = params["w2"], params["b2"]
    w3, b3 = params["w3"], params["b3"]
    B, state_size = x.shape
    a_pad = w3.shape[0]                     # action_size padded to sublanes

    # --- batch tile selection -------------------------------------------
    # Lane-dense multiple of 128; large enough (default 1024) to amortise the
    # ~0.35 us/step pipeline overhead; at least 2 grid steps when B permits so
    # v7x can shard the batch axis across both TensorCores.
    B128 = _round_up(B, 128)
    bm = min(_round_up(block_batch, 128), B128)
    if B128 >= 256 and bm > B128 // 2:
        bm = _round_up(B128 // 2, 128)
    B_pad = _round_up(B128, bm)             # whole tiles -> unmasked stores
    grid = (B_pad // bm,)

    # Batch-on-lanes input slab (state, B_pad); stays f32 (cast is in-kernel).
    xT = x.T
    if B_pad != B:
        xT = jnp.pad(xT, ((0, 0), (0, B_pad - B)))

    x_map = lambda i: (0, i)                # walk batch (lane) tiles
    w_map = lambda i: (0, 0)                # constant block -> VMEM-resident

    out = pl.pallas_call(
        dqn_kernel,
        out_shape=jax.ShapeDtypeStruct((a_pad, B_pad), jnp.float32),
        grid=grid,
        in_specs=[
            pl.BlockSpec((state_size, bm), x_map),
            pl.BlockSpec(w1.shape, w_map),
            pl.BlockSpec(b1.shape, w_map),
            pl.BlockSpec(w2.shape, w_map),
            pl.BlockSpec(b2.shape, w_map),
            pl.BlockSpec(w3.shape, w_map),
            pl.BlockSpec(b3.shape, w_map),
        ],
        out_specs=pl.BlockSpec((a_pad, bm), x_map),
        compiler_params=pltpu.CompilerParams(
            dimension_semantics=("parallel",)),     # 2 TCs on v7x
    )(xT, w1, b1, w2, b2, w3, b3)

    # Contiguous row slice of the tiny (8, B_pad) slab, then transpose back to
    # the PyTorch (B, action_size) convention.
    return out[:action_size, :B].T


# ---------------------------------------------------------------------------
# Parameter construction
# ---------------------------------------------------------------------------
def init_params(key, state_size, hidden_size, action_size):
    """PyTorch nn.Linear default init U[-1/sqrt(fan_in), +1/sqrt(fan_in)];
    weights kept in PyTorch (out, in) orientation, biases as (out, 1)."""
    dims = [state_size, hidden_size[0], hidden_size[1], action_size]
    params = {}
    for i, (wn, bn) in enumerate([("w1", "b1"), ("w2", "b2"), ("w3", "b3")]):
        fan_in, fan_out = dims[i], dims[i + 1]
        key, kw, kb = jax.random.split(key, 3)
        bound = 1.0 / jnp.sqrt(fan_in)
        params[wn] = jax.random.uniform(kw, (fan_out, fan_in), jnp.float32,
                                        -bound, bound)
        params[bn] = jax.random.uniform(kb, (fan_out, 1), jnp.float32,
                                        -bound, bound)
    return params


def prepare_params(params, *, compute_dtype=jnp.bfloat16, sublane=8):
    """Pad every out-feature dim (the sublane axis of the batch-on-lanes
    activations) up to a multiple of 8, and pad the next layer's in-feature
    dim to match.  Zero weight rows/cols and zero biases are inert under
    matmul + ReLU.  Weights are cast to the compute dtype; biases stay f32
    (elementwise path is f32 on all generations).  Feature dims are NOT padded
    to 128/256 — the kernel is DMA/overhead-bound, not MXU-bound."""
    w1, b1 = params["w1"], params["b1"]
    w2, b2 = params["w2"], params["b2"]
    w3, b3 = params["w3"], params["b3"]

    s = w1.shape[1]
    h1 = _round_up(w1.shape[0], sublane)
    h2 = _round_up(w2.shape[0], sublane)
    a = _round_up(w3.shape[0], sublane)

    def pad2(m, rows, cols):
        return jnp.pad(m, ((0, rows - m.shape[0]), (0, cols - m.shape[1])))

    return {
        "w1": pad2(w1, h1, s).astype(compute_dtype),
        "b1": pad2(b1, h1, 1).astype(jnp.float32),
        "w2": pad2(w2, h2, h1).astype(compute_dtype),
        "b2": pad2(b2, h2, 1).astype(jnp.float32),
        "w3": pad2(w3, a, h2).astype(compute_dtype),
        "b3": pad2(b3, a, 1).astype(jnp.float32),
    }


def dqn_reference(x, params):
    h1 = jnp.maximum(x @ params["w1"].T + params["b1"][:, 0], 0.0)
    h2 = jnp.maximum(h1 @ params["w2"].T + params["b2"][:, 0], 0.0)
    return h2 @ params["w3"].T + params["b3"][:, 0]


# ---------------------------------------------------------------------------
if __name__ == "__main__":
    key = jax.random.PRNGKey(0)
    state_size = 8
    hidden_size = (32, 32)
    action_size = 4

    raw_params = init_params(key, state_size, hidden_size, action_size)
    fwd = jax.jit(functools.partial(dqn_forward, action_size=action_size))

    params_f32 = prepare_params(raw_params, compute_dtype=jnp.float32)
    params_bf16 = prepare_params(raw_params, compute_dtype=jnp.bfloat16)

    for batch in (256, 96):    # 2 full grid steps; and a padded partial batch
        key, kx = jax.random.split(key)
        x = jax.random.normal(kx, (batch, state_size), jnp.float32)
        ref = dqn_reference(x, raw_params)

        # 1) f32 compute path: exact check against the reference.
        out_f32 = jax.block_until_ready(fwd(x, params_f32))
        assert out_f32.shape == (batch, action_size)
        assert jnp.allclose(out_f32, ref, atol=1e-5, rtol=1e-5), "f32 mismatch"

        # 2) bf16 compute path (fast path on v6e/v7x MXU): loose tolerance.
        out_bf16 = jax.block_until_ready(fwd(x, params_bf16))
        assert out_bf16.shape == (batch, action_size)
        assert jnp.allclose(out_bf16, ref, atol=3e-2, rtol=3e-2), "bf16 mismatch"

    print("KERNEL_OK")
</pallas_src>

<mosaic_0001>
module attributes {stable_mosaic.version = 11 : i64} {
  func.func @dqn_kernel(%arg0: i32, %arg1: memref<8x128xf32, #tpu.memory_space<vmem>>, %arg2: memref<32x8xf32, #tpu.memory_space<vmem>>, %arg3: memref<32x1xf32, #tpu.memory_space<vmem>>, %arg4: memref<32x32xf32, #tpu.memory_space<vmem>>, %arg5: memref<32x1xf32, #tpu.memory_space<vmem>>, %arg6: memref<8x32xf32, #tpu.memory_space<vmem>>, %arg7: memref<8x1xf32, #tpu.memory_space<vmem>>, %arg8: memref<8x128xf32, #tpu.memory_space<vmem>>) attributes {dimension_semantics = [#tpu.dimension_semantics<parallel>], iteration_bounds = array<i64: 2>, scalar_prefetch = 0 : i64, scratch_operands = 0 : i64, tpu.core_type = #tpu.core_type<tc>, window_params = [{transform_indices = @transform_0, window_bounds = array<i64: 8, 128>}, {pipeline_mode = #tpu.pipeline_mode<synchronous>, transform_indices = @transform_1, window_bounds = array<i64: 32, 8>}, {pipeline_mode = #tpu.pipeline_mode<synchronous>, transform_indices = @transform_2, window_bounds = array<i64: 32, 1>}, {pipeline_mode = #tpu.pipeline_mode<synchronous>, transform_indices = @transform_3, window_bounds = array<i64: 32, 32>}, {pipeline_mode = #tpu.pipeline_mode<synchronous>, transform_indices = @transform_4, window_bounds = array<i64: 32, 1>}, {pipeline_mode = #tpu.pipeline_mode<synchronous>, transform_indices = @transform_5, window_bounds = array<i64: 8, 32>}, {pipeline_mode = #tpu.pipeline_mode<synchronous>, transform_indices = @transform_6, window_bounds = array<i64: 8, 1>}, {transform_indices = @transform_7, window_bounds = array<i64: 8, 128>}]} {
    %c0 = arith.constant 0 : index
    %c0_0 = arith.constant 0 : index
    %0 = vector.load %arg1[%c0, %c0_0] : memref<8x128xf32, #tpu.memory_space<vmem>>, vector<8x128xf32>
    %c0_1 = arith.constant 0 : index
    %c0_2 = arith.constant 0 : index
    %1 = vector.load %arg2[%c0_1, %c0_2] : memref<32x8xf32, #tpu.memory_space<vmem>>, vector<32x8xf32>
    %cst = arith.constant dense<0.000000e+00> : vector<32x128xf32>
    %2 = tpu.matmul %1, %0, %cst {dimension_numbers = #tpu.dot_dimension_numbers<[1], [0], [0], [1], [0, 0, 1, 1], [], []>} : vector<32x8xf32>, vector<8x128xf32>, vector<32x128xf32> -> vector<32x128xf32>
    %c0_3 = arith.constant 0 : index
    %c0_4 = arith.constant 0 : index
    %3 = vector.load %arg3[%c0_3, %c0_4] : memref<32x1xf32, #tpu.memory_space<vmem>>, vector<32x1xf32>
    %4 = vector.broadcast %3 : vector<32x1xf32> to vector<32x128xf32>
    %5 = arith.addf %2, %4 : vector<32x128xf32>
    %cst_5 = arith.constant 0.000000e+00 : f32
    %6 = vector.broadcast %cst_5 : f32 to vector<32x128xf32>
    %7 = arith.maximumf %5, %6 : vector<32x128xf32>
    %c0_6 = arith.constant 0 : index
    %c0_7 = arith.constant 0 : index
    %8 = vector.load %arg4[%c0_6, %c0_7] : memref<32x32xf32, #tpu.memory_space<vmem>>, vector<32x32xf32>
    %cst_8 = arith.constant dense<0.000000e+00> : vector<32x128xf32>
    %9 = tpu.matmul %8, %7, %cst_8 {dimension_numbers = #tpu.dot_dimension_numbers<[1], [0], [0], [1], [0, 0, 1, 1], [], []>} : vector<32x32xf32>, vector<32x128xf32>, vector<32x128xf32> -> vector<32x128xf32>
    %c0_9 = arith.constant 0 : index
    %c0_10 = arith.constant 0 : index
    %10 = vector.load %arg5[%c0_9, %c0_10] : memref<32x1xf32, #tpu.memory_space<vmem>>, vector<32x1xf32>
    %11 = vector.broadcast %10 : vector<32x1xf32> to vector<32x128xf32>
    %12 = arith.addf %9, %11 : vector<32x128xf32>
    %cst_11 = arith.constant 0.000000e+00 : f32
    %13 = vector.broadcast %cst_11 : f32 to vector<32x128xf32>
    %14 = arith.maximumf %12, %13 : vector<32x128xf32>
    %c0_12 = arith.constant 0 : index
    %c0_13 = arith.constant 0 : index
    %15 = vector.load %arg6[%c0_12, %c0_13] : memref<8x32xf32, #tpu.memory_space<vmem>>, vector<8x32xf32>
    %cst_14 = arith.constant dense<0.000000e+00> : vector<8x128xf32>
    %16 = tpu.matmul %15, %14, %cst_14 {dimension_numbers = #tpu.dot_dimension_numbers<[1], [0], [0], [1], [0, 0, 1, 1], [], []>} : vector<8x32xf32>, vector<32x128xf32>, vector<8x128xf32> -> vector<8x128xf32>
    %c0_15 = arith.constant 0 : index
    %c0_16 = arith.constant 0 : index
    %17 = vector.load %arg7[%c0_15, %c0_16] : memref<8x1xf32, #tpu.memory_space<vmem>>, vector<8x1xf32>
    %18 = vector.broadcast %17 : vector<8x1xf32> to vector<8x128xf32>
    %19 = arith.addf %16, %18 : vector<8x128xf32>
    %c0_17 = arith.constant 0 : index
    %c0_18 = arith.constant 0 : index
    %20 = vector.load %arg8[%c0_17, %c0_18] : memref<8x128xf32, #tpu.memory_space<vmem>>, vector<8x128xf32>
    tpu.vector_store %arg8[%c0_17, %c0_18], %19 {strides = array<i32>} : memref<8x128xf32, #tpu.memory_space<vmem>>, vector<8x128xf32>,
    return
  }
  func.func @transform_0(%arg0: i32) -> (i32, i32) {
    %c0_i32 = arith.constant 0 : i32
    %c0_i32_0 = arith.constant 0 : i32
    return %c0_i32, %arg0 : i32, i32
  }
  func.func @transform_1(%arg0: i32) -> (i32, i32) {
    %c0_i32 = arith.constant 0 : i32
    %c0_i32_0 = arith.constant 0 : i32
    %c0_i32_1 = arith.constant 0 : i32
    return %c0_i32, %c0_i32_0 : i32, i32
  }
  func.func @transform_2(%arg0: i32) -> (i32, i32) {
    %c0_i32 = arith.constant 0 : i32
    %c0_i32_0 = arith.constant 0 : i32
    %c0_i32_1 = arith.constant 0 : i32
    return %c0_i32, %c0_i32_0 : i32, i32
  }
  func.func @transform_3(%arg0: i32) -> (i32, i32) {
    %c0_i32 = arith.constant 0 : i32
    %c0_i32_0 = arith.constant 0 : i32
    %c0_i32_1 = arith.constant 0 : i32
    return %c0_i32, %c0_i32_0 : i32, i32
  }
  func.func @transform_4(%arg0: i32) -> (i32, i32) {
    %c0_i32 = arith.constant 0 : i32
    %c0_i32_0 = arith.constant 0 : i32
    %c0_i32_1 = arith.constant 0 : i32
    return %c0_i32, %c0_i32_0 : i32, i32
  }
  func.func @transform_5(%arg0: i32) -> (i32, i32) {
    %c0_i32 = arith.constant 0 : i32
    %c0_i32_0 = arith.constant 0 : i32
    %c0_i32_1 = arith.constant 0 : i32
    return %c0_i32, %c0_i32_0 : i32, i32
  }
  func.func @transform_6(%arg0: i32) -> (i32, i32) {
    %c0_i32 = arith.constant 0 : i32
    %c0_i32_0 = arith.constant 0 : i32
    %c0_i32_1 = arith.constant 0 : i32
    return %c0_i32, %c0_i32_0 : i32, i32
  }
  func.func @transform_7(%arg0: i32) -> (i32, i32) {
    %c0_i32 = arith.constant 0 : i32
    %c0_i32_0 = arith.constant 0 : i32
    return %c0_i32, %arg0 : i32, i32
  }
}

</mosaic_0001>

<bundles_post_ra>
// kernel: dqn_forward.1
= control target key start
LH: loop header
LB: loop body
LE: loop exit
PB: predicated region body
PF: predicated region fallthrough
CT: control target
= control target key end

     0   :  { %s591_s24 = smov 0   ;;  %s678_s0 = inlined_call_operand.vmem [shape: f32[8,256], index: 0, kind: input, shape index: {}]   ;;  %s679_s1 = inlined_call_operand.vmem [shape: f32[32,8], index: 1, kind: input, shape index: {}]   ;;  %s680_s2 = inlined_call_operand.vmem [shape: f32[32,1], index: 2, kind: input, shape index: {}]   ;;  %s681_s3 = inlined_call_operand.vmem [shape: f32[32,32], index: 3, kind: input, shape index: {}]   ;;  %s682_s4 = inlined_call_operand.vmem [shape: f32[32,1], index: 4, kind: input, shape index: {}]   ;;  %s683_s5 = inlined_call_operand.vmem [shape: f32[8,32], index: 5, kind: input, shape index: {}]   ;;  %s684_s6 = inlined_call_operand.vmem [shape: f32[8,1], index: 6, kind: input, shape index: {}]   ;;  %s685_s7 = inlined_call_operand.vmem [shape: f32[8,256], index: 7, kind: output, shape index: {}]  }
   0x1 LB: > { %s507_s25 = sadd.s32 4294967295, %s548_s24   ;;  %p511_p0 = scmp.ge.s32.totalorder %s548_s24, 1  ;;  %s548_s24 = sphi %s591_s24, %s17_s24  }
   0x2   : > { %p236_p1 = scmp.lt.s32.totalorder %s548_s24, 3 }
   0x4   : > { %p237_p2 = pnand %p511_p0, %p236_p1 }
   0x5   : > { %p266_p3 = scmp.lt.s32.totalorder (!%p237_p2), %s507_s25, 1 }
   0x6   : > { %240 = sbr.rel (%p237_p2) target bundleno = 453 (0x1c5), region = 48 }
   0xb   : > { %v282_v0 = vld [vmem:[%s680_s2 + $0x18] sm:$0xff]  ;;  %v550_v1 = vmov 0   ;;  %v280_v2 = vld [vmem:[%s680_s2 + $0x8] sm:$0xff]  ;;  %s687_s25 = smov (!%p266_p3, %s507_s25), 1  ;;  %v275_v3 = vld [vmem:[%s679_s1] sm:$0xff]  ;;  %vm303_vm0 = vcmask 64512  }
   0xc   : > { %540 = vset.pattern.permute.xlu1 %v550_v1  ;;  %539 = vset.pattern.permute.xlu0 %v550_v1  ;;  %s512_s30 = sshll.u32 %s687_s25, 3  ;;  %v278_v4 = vld [vmem:[%s679_s1 + $0x18] sm:$0xff]  ;;  %v281_v6 = vld [vmem:[%s680_s2 + $0x10] sm:$0xff]  ;;  %v279_v7 = vld [vmem:[%s680_s2] sm:$0xff]  ;;  %vm377_vm1 = vcmask 261120  }
   0xd   : > { %300 = vperm.xlu0 %539, %v282_v0   ;;  %290 = vperm.xlu1 %540, %v280_v2   ;;  %s269_s10 = scalar_lea.vmem %s678_s0, %s512_s30  ;;  %v276_v8 = vld [vmem:[%s679_s1 + $0x8] sm:$0xff]  ;;  %v353_v10 = vld [vmem:[%s682_s4] sm:$0xff]  ;;  %v277_v11 = vld [vmem:[%s679_s1 + $0x10] sm:$0xff]  ;;  %s273_s27 = scalar_lea.vmem %s685_s7, %s512_s30 }
   0xe   : > { %541 = vset.pattern.permute.xlu2 %v550_v1  ;;  %v274_v5 = vld [vmem:[%s269_s10] sm:$0xff]  ;;  %v354_v9 = vld [vmem:[%s682_s4 + $0x8] sm:$0xff]  ;;  %v356_v13 = vld [vmem:[%s682_s4 + $0x18] sm:$0xff] }
   0xf   : > { %331 = vmatpush.msra.mxu0 %v274_v5  ;;  %525 = vmatpush.msra.mxu2 %v274_v5  ;;  %v355_v20 = vld [vmem:[%s682_s4 + $0x10] sm:$0xff]  ;;  %v424_v26 = vld [vmem:[%s684_s6] sm:$0xff]  ;;  %v350_v33 = vld [vmem:[%s681_s3 + $0x8] sm:$0xff] }
  0x10   : > { %514 = vmatmul.msk.f32.vlgmr.msra.gmra.mxu0 %vm303_vm0, %v275_v3  ;;  %517 = vmatmul.msk.f32.vlgmr.msra.gmra.mxu2 %vm303_vm0, %v278_v4  ;;  %v349_v31 = vld [vmem:[%s681_s3] sm:$0xff]  ;;  %v351_v32 = vld [vmem:[%s681_s3 + $0x10] sm:$0xff]  ;;  %v352_v34 = vld [vmem:[%s681_s3 + $0x18] sm:$0xff] }
  0x11   : > { %374 = vperm.xlu2 %541, %v356_v13   ;;  %v423_v51 = vld [vmem:[%s683_s5] sm:$0xff] }
  0x15   : > { %295 = vperm.xlu0 %539, %v281_v6   ;;  %285 = vperm.xlu1 %540, %v279_v7  }
  0x18   : > { %515 = vmatmul.msk.f32.gmra.mxu0 %vm303_vm0, %v276_v8 }
  0x19   : > { %369 = vperm.xlu2 %541, %v355_v20  }
  0x1d   : > { %364 = vperm.xlu0 %539, %v354_v9   ;;  %359 = vperm.xlu1 %540, %v353_v10  }
  0x20   : > { %516 = vmatmul.msk.f32.gmra.mxu0 %vm303_vm0, %v277_v11 }
  0x21   : > { %427 = vperm.xlu2 %541, %v424_v26  }
  0x6b   : > { %v375_v35 = vpop.permute.xlu2 %374 }
  0x73   : > { %v370_v38 = vpop.permute.xlu2 %369 }
  0x7b   : > { %v428_v52 = vpop.permute.xlu2 %427 }
  0x7f   : > { %v301_v14 = vpop.permute.xlu0 %300  ;;  %v291_v15 = vpop.permute.xlu1 %290 }
  0x87   : > { %v296_v21 = vpop.permute.xlu0 %295  ;;  %v286_v22 = vpop.permute.xlu1 %285 }
  0x8d   : > { %v333_v12 = vpop.f32.mrf.mxu0 }
  0x8e   : > { %v334_v27 = vadd.f32 %v333_v12, %v286_v22 }
  0x8f   : > { %v365_v43 = vpop.permute.xlu0 %364  ;;  %v360_v46 = vpop.permute.xlu1 %359 }
  0x90   : > { %v345_v30 = vmax.f32 %v334_v27, 0.0 }
  0x93   : > { %v342_v16 = vpop.f32.mrf.mxu2 }
  0x94   : > { %v343_v17 = vadd.f32 %v342_v16, %v301_v14 }
  0x95   : > { %v336_v18 = vpop.f32.mrf.mxu0 }
  0x96   : > { %v348_v19 = vmax.f32 %v343_v17, 0.0  ;;  %v337_v24 = vadd.f32 %v336_v18, %v291_v15 }
  0x98   : > { %402 = vmatpush.msra.mxu1 %v348_v19  ;;  %526 = vmatpush.msra.mxu3 %v348_v19  ;;  %v346_v29 = vmax.f32 %v337_v24, 0.0 }
  0x9d   : > { %v339_v23 = vpop.f32.mrf.mxu0 }
  0x9e   : > { %v340_v25 = vadd.f32 %v339_v23, %v296_v21 }
  0xa0   : > { %v347_v28 = vmax.f32 %v340_v25, 0.0 }
  0xa2   : > { %403 = vmatpush.msra.mxu1 %v347_v28  ;;  %527 = vmatpush.msra.mxu3 %v347_v28 }
  0xa4   : > { %404 = vmatpush.msra.mxu1 %v346_v29  ;;  %528 = vmatpush.msra.mxu3 %v346_v29 }
  0xa6   : > { %405 = vmatpush.msra.mxu1 %v345_v30  ;;  %529 = vmatpush.msra.mxu3 %v345_v30 }
  0xa7   : > { %518 = vmatmul.msk.f32.vlgmr.msra.gmra.mxu1 %vm377_vm1, %v349_v31  ;;  %520 = vmatmul.msk.f32.vlgmr.msra.gmra.mxu3 %vm377_vm1, %v351_v32 }
  0xaf   : > { %519 = vmatmul.msk.f32.gmra.mxu1 %vm377_vm1, %v350_v33  ;;  %521 = vmatmul.msk.f32.gmra.mxu3 %vm377_vm1, %v352_v34 }
 0x124   : > { %v407_v36 = vpop.f32.mrf.mxu1 }
 0x125   : > { %v408_v47 = vadd.f32 %v407_v36, %v360_v46 }
 0x127   : > { %v419_v50 = vmax.f32 %v408_v47, 0.0 }
 0x12a   : > { %v413_v37 = vpop.f32.mrf.mxu3 }
 0x12b   : > { %v414_v41 = vadd.f32 %v413_v37, %v370_v38 }
 0x12c   : > { %v410_v39 = vpop.f32.mrf.mxu1 }
 0x12d   : > { %v411_v44 = vadd.f32 %v410_v39, %v365_v43  ;;  %v421_v48 = vmax.f32 %v414_v41, 0.0 }
 0x12f   : > { %v420_v49 = vmax.f32 %v411_v44, 0.0 }
 0x132   : > { %v416_v40 = vpop.f32.mrf.mxu3 }
 0x133   : > { %v417_v42 = vadd.f32 %v416_v40, %v375_v35 }
 0x135   : > { %v422_v45 = vmax.f32 %v417_v42, 0.0 }
 0x137   : > { %445 = vmatpush.msrb.mxu2 %v422_v45 }
 0x139   : > { %446 = vmatpush.msrb.mxu2 %v421_v48 }
 0x13b   : > { %447 = vmatpush.msrb.mxu2 %v420_v49 }
 0x13d   : > { %448 = vmatpush.msrb.mxu2 %v419_v50 }
 0x13e   : > { %522 = vmatmul.msk.f32.vlgmr.msrb.gmra.mxu2 %vm377_vm1, %v423_v51 }
 0x1c1   : > { %v450_v53 = vpop.f32.mrf.mxu2 }
 0x1c2   : > { %v451_v54 = vadd.f32 %v450_v53, %v428_v52 }
 0x1c4   : > { %453 = vst [vmem:[%s273_s27] sm:$0xff] %v451_v54 }
 0x1c5 PF: > { %s17_s24 = sadd.s32 1, %s548_s24  }
 0x1c6   : > { %p14_p4 = scmp.ge.s32.totalorder %s17_s24, 4  }
 0x1c8   :  { %16 = sbr.rel (!%p14_p4) target bundleno = 1 (0x1), region = 78 }

</bundles_post_ra>
